<compile_context>
chip_gen: v6e
topology: v6e:2x2x1
jax: 0.10.0
libtpu: 0.0.40
codegen_flags: <defaults>
</compile_context>

<pallas_src>
import functools

import jax
import jax.numpy as jnp
from jax.experimental import pallas as pl
from jax.experimental.pallas import tpu as pltpu


def _transformer_block_kernel(
    x_ref,
    wq_ref, bq_ref, wk_ref, bk_ref, wv_ref, bv_ref, wo_ref, bo_ref,
    g1_ref, s1_ref, g2_ref, s2_ref,
    w1_ref, bf1_ref, w2_ref, bf2_ref,
    o_ref,
    *, num_heads, eps):
    T, D = x_ref.shape                       # one sequence per grid step
    H = num_heads
    hd = D // H
    cdt = x_ref.dtype                        # MXU operand dtype

    x = x_ref[...].astype(jnp.float32)       # residual / LN path in f32

    def layernorm(v, g, s):                  # matches reference op-for-op
        mean = jnp.mean(v, axis=-1, keepdims=True)
        var = jnp.mean((v - mean) ** 2, axis=-1, keepdims=True)
        return (v - mean) / jnp.sqrt(var + eps) * g + s

    # ---------------- Attention sub-block ----------------
    xn1 = layernorm(x, g1_ref[...], s1_ref[...]).astype(cdt)          # (T, D)

    # Lane-dense full-width projections (output dim = D, not hd).
    q = jnp.dot(xn1, wq_ref[...], preferred_element_type=jnp.float32) + bq_ref[...]
    k = jnp.dot(xn1, wk_ref[...], preferred_element_type=jnp.float32) + bk_ref[...]
    v = jnp.dot(xn1, wv_ref[...], preferred_element_type=jnp.float32) + bv_ref[...]

    # Split heads only for the score / context contractions.
    qh = q.reshape(T, H, hd).transpose(1, 0, 2)                        # (H, T, hd)
    kh = k.reshape(T, H, hd).transpose(1, 0, 2)
    vh = v.reshape(T, H, hd).transpose(1, 0, 2)

    # Scores: contract head_dim directly, batched over heads.
    s = jax.lax.dot_general(qh, kh, (((2,), (2,)), ((0,), (0,))),
                            preferred_element_type=jnp.float32)        # (H, T, T)
    s = s / jnp.sqrt(jnp.float32(hd))

    row = jax.lax.broadcasted_iota(jnp.int32, (T, T), 0)
    col = jax.lax.broadcasted_iota(jnp.int32, (T, T), 1)
    s = jnp.where((col > row)[None, :, :], jnp.float32(-1e30), s)      # NaN-safe mask

    m = jnp.max(s, axis=-1, keepdims=True)
    p = jnp.exp(s - m)
    p = p / jnp.sum(p, axis=-1, keepdims=True)   # exact softmax (no approx recip)
    # TODO(synk): attention-weight dropout omitted (eval mode / drop_rate=0).

    ctx = jax.lax.dot_general(p, vh, (((2,), (1,)), ((0,), (0,))),
                              preferred_element_type=jnp.float32)      # (H, T, hd)

    # Head concat -> one lane-dense output projection.
    ctx = ctx.transpose(1, 0, 2).reshape(T, D).astype(cdt)             # (T, D)
    att = jnp.dot(ctx, wo_ref[...],
                  preferred_element_type=jnp.float32) + bo_ref[...]

    x1 = att + x                             # residual (drop_shortcut = id)

    # ---------------- FeedForward sub-block ----------------
    xn2 = layernorm(x1, g2_ref[...], s2_ref[...]).astype(cdt)
    h1 = jnp.dot(xn2, w1_ref[...],
                 preferred_element_type=jnp.float32) + bf1_ref[...]
    c = jnp.float32(0.7978845608028654)      # sqrt(2/pi), tanh-GELU
    gelu = 0.5 * h1 * (1.0 + jnp.tanh(c * (h1 + 0.044715 * (h1 * h1 * h1))))
    # TODO(synk): tile over Dff with a VMEM accumulator at production sizes.
    ff = jnp.dot(gelu.astype(cdt), w2_ref[...],
                 preferred_element_type=jnp.float32) + bf2_ref[...]

    out = ff + x1                            # residual (drop_shortcut = id)
    o_ref[...] = out.astype(o_ref.dtype)


def transformer_block(x, params, *, num_heads, eps=1e-5):
    B, T, D = x.shape
    H = num_heads
    hd = D // H
    Dff = params["w1"].shape[1]
    N = B * T

    kernel = functools.partial(_transformer_block_kernel, num_heads=H, eps=eps)

    # Per-sequence row blocks; weights / biases fully resident.
    row_spec = pl.BlockSpec((T, D), lambda b: (b, 0))
    w_dd = pl.BlockSpec((D, D), lambda b: (0, 0))
    b_d = pl.BlockSpec((1, D), lambda b: (0, 0))
    w_dff = pl.BlockSpec((D, Dff), lambda b: (0, 0))
    b_dff = pl.BlockSpec((1, Dff), lambda b: (0, 0))
    w_ffd = pl.BlockSpec((Dff, D), lambda b: (0, 0))

    flops = B * (2 * T * D * D * 4           # QKV + out projection
                 + 2 * H * T * T * hd * 2    # scores + p@v
                 + 2 * T * D * Dff * 2)      # feed-forward
    transcendentals = B * (H * T * T + T * Dff + 2 * T)
    bytes_accessed = 4 * (2 * N * D + 4 * D * D + 2 * D * Dff + 10 * D + Dff)

    out2d = pl.pallas_call(
        kernel,
        out_shape=jax.ShapeDtypeStruct((N, D), x.dtype),
        grid_spec=pltpu.PrefetchScalarGridSpec(
            num_scalar_prefetch=0,
            grid=(B,),
            in_specs=[row_spec,
                      w_dd, b_d, w_dd, b_d, w_dd, b_d, w_dd, b_d,
                      b_d, b_d, b_d, b_d,
                      w_dff, b_dff, w_ffd, b_d],
            out_specs=row_spec),
        compiler_params=pltpu.CompilerParams(
            dimension_semantics=("parallel",),   # shard batch across TCs on v7x
            vmem_limit_bytes=32 << 20),
        cost_estimate=pl.CostEstimate(
            flops=int(flops),
            transcendentals=int(transcendentals),
            bytes_accessed=int(bytes_accessed)),
    )(x.reshape(N, D),
      params["wq"], params["bq"], params["wk"], params["bk"],
      params["wv"], params["bv"], params["wo"], params["bo"],
      params["g1"], params["s1"], params["g2"], params["s2"],
      params["w1"], params["bf1"], params["w2"], params["bf2"])

    return out2d.reshape(B, T, D)


def _reference(x, p, num_heads, eps=1e-5):
    """Pure-JAX reference replicating the PyTorch forward (eval mode)."""
    B, T, D = x.shape
    hd = D // num_heads

    def ln(v, g, s):
        m = jnp.mean(v, axis=-1, keepdims=True)
        var = jnp.mean((v - m) ** 2, axis=-1, keepdims=True)
        return (v - m) / jnp.sqrt(var + eps) * g + s

    sc = x
    xn = ln(x, p["g1"], p["s1"])
    q = xn @ p["wq"] + p["bq"]
    k = xn @ p["wk"] + p["bk"]
    v = xn @ p["wv"] + p["bv"]
    q = q.reshape(B, T, num_heads, hd).transpose(0, 2, 1, 3)
    k = k.reshape(B, T, num_heads, hd).transpose(0, 2, 1, 3)
    v = v.reshape(B, T, num_heads, hd).transpose(0, 2, 1, 3)
    s = jnp.einsum("bhqd,bhkd->bhqk", q, k) / (hd ** 0.5)
    mask = jnp.triu(jnp.ones((T, T), bool), k=1)
    s = jnp.where(mask, -jnp.inf, s)
    w = jax.nn.softmax(s, axis=-1)
    ctx = jnp.einsum("bhqk,bhkd->bhqd", w, v).transpose(0, 2, 1, 3).reshape(B, T, D)
    att = ctx @ p["wo"] + p["bo"]
    x1 = att + sc
    xn2 = ln(x1, p["g2"], p["s2"])
    h1 = xn2 @ p["w1"] + p["bf1"]
    c = (2.0 / jnp.pi) ** 0.5
    g = 0.5 * h1 * (1.0 + jnp.tanh(c * (h1 + 0.044715 * h1 ** 3)))
    ff = g @ p["w2"] + p["bf2"]
    return ff + x1


if __name__ == "__main__":
    # cfg: emb_dim=32, context_length=8, n_heads=4, drop_rate=0.0 (eval), qkv_bias=True
    B, T, D, H = 2, 8, 32, 4
    Dff = 4 * D

    key = jax.random.PRNGKey(0)
    ks = jax.random.split(key, 16)

    def rnd(k, shape, s=0.05):
        return (s * jax.random.normal(k, shape)).astype(jnp.float32)

    # Weights stored already transposed relative to torch nn.Linear (y = x @ W + b).
    params = {
        "wq": rnd(ks[0], (D, D)),  "bq": rnd(ks[1], (1, D)),
        "wk": rnd(ks[2], (D, D)),  "bk": rnd(ks[3], (1, D)),
        "wv": rnd(ks[4], (D, D)),  "bv": rnd(ks[5], (1, D)),
        "wo": rnd(ks[6], (D, D)),  "bo": rnd(ks[7], (1, D)),
        "g1": jnp.ones((1, D), jnp.float32), "s1": jnp.zeros((1, D), jnp.float32),
        "g2": jnp.ones((1, D), jnp.float32), "s2": jnp.zeros((1, D), jnp.float32),
        "w1": rnd(ks[8], (D, Dff)),  "bf1": rnd(ks[9], (1, Dff)),
        "w2": rnd(ks[10], (Dff, D)), "bf2": rnd(ks[11], (1, D)),
    }

    x = jax.random.normal(ks[12], (B, T, D), dtype=jnp.float32)

    out = transformer_block(x, params, num_heads=H)
    out = jax.block_until_ready(out)

    ref = _reference(x, params, H)
    assert out.shape == (B, T, D)
    assert jnp.allclose(out, ref, atol=2e-4, rtol=2e-4), (
        float(jnp.max(jnp.abs(out - ref))))

    print("KERNEL_OK")
</pallas_src>

<mosaic_0001>
module attributes {stable_mosaic.version = 11 : i64} {
  func.func @_transformer_block_kernel(%arg0: i32, %arg1: memref<8x32xf32, #tpu.memory_space<vmem>>, %arg2: memref<32x32xf32, #tpu.memory_space<vmem>>, %arg3: memref<1x32xf32, #tpu.memory_space<vmem>>, %arg4: memref<32x32xf32, #tpu.memory_space<vmem>>, %arg5: memref<1x32xf32, #tpu.memory_space<vmem>>, %arg6: memref<32x32xf32, #tpu.memory_space<vmem>>, %arg7: memref<1x32xf32, #tpu.memory_space<vmem>>, %arg8: memref<32x32xf32, #tpu.memory_space<vmem>>, %arg9: memref<1x32xf32, #tpu.memory_space<vmem>>, %arg10: memref<1x32xf32, #tpu.memory_space<vmem>>, %arg11: memref<1x32xf32, #tpu.memory_space<vmem>>, %arg12: memref<1x32xf32, #tpu.memory_space<vmem>>, %arg13: memref<1x32xf32, #tpu.memory_space<vmem>>, %arg14: memref<32x128xf32, #tpu.memory_space<vmem>>, %arg15: memref<1x128xf32, #tpu.memory_space<vmem>>, %arg16: memref<128x32xf32, #tpu.memory_space<vmem>>, %arg17: memref<1x32xf32, #tpu.memory_space<vmem>>, %arg18: memref<8x32xf32, #tpu.memory_space<vmem>>) attributes {dimension_semantics = [#tpu.dimension_semantics<parallel>], iteration_bounds = array<i64: 2>, scalar_prefetch = 0 : i64, scratch_operands = 0 : i64, tpu.core_type = #tpu.core_type<tc>, window_params = [{transform_indices = @transform_0, window_bounds = array<i64: 8, 32>}, {pipeline_mode = #tpu.pipeline_mode<synchronous>, transform_indices = @transform_1, window_bounds = array<i64: 32, 32>}, {pipeline_mode = #tpu.pipeline_mode<synchronous>, transform_indices = @transform_2, window_bounds = array<i64: 1, 32>}, {pipeline_mode = #tpu.pipeline_mode<synchronous>, transform_indices = @transform_3, window_bounds = array<i64: 32, 32>}, {pipeline_mode = #tpu.pipeline_mode<synchronous>, transform_indices = @transform_4, window_bounds = array<i64: 1, 32>}, {pipeline_mode = #tpu.pipeline_mode<synchronous>, transform_indices = @transform_5, window_bounds = array<i64: 32, 32>}, {pipeline_mode = #tpu.pipeline_mode<synchronous>, transform_indices = @transform_6, window_bounds = array<i64: 1, 32>}, {pipeline_mode = #tpu.pipeline_mode<synchronous>, transform_indices = @transform_7, window_bounds = array<i64: 32, 32>}, {pipeline_mode = #tpu.pipeline_mode<synchronous>, transform_indices = @transform_8, window_bounds = array<i64: 1, 32>}, {pipeline_mode = #tpu.pipeline_mode<synchronous>, transform_indices = @transform_9, window_bounds = array<i64: 1, 32>}, {pipeline_mode = #tpu.pipeline_mode<synchronous>, transform_indices = @transform_10, window_bounds = array<i64: 1, 32>}, {pipeline_mode = #tpu.pipeline_mode<synchronous>, transform_indices = @transform_11, window_bounds = array<i64: 1, 32>}, {pipeline_mode = #tpu.pipeline_mode<synchronous>, transform_indices = @transform_12, window_bounds = array<i64: 1, 32>}, {pipeline_mode = #tpu.pipeline_mode<synchronous>, transform_indices = @transform_13, window_bounds = array<i64: 32, 128>}, {pipeline_mode = #tpu.pipeline_mode<synchronous>, transform_indices = @transform_14, window_bounds = array<i64: 1, 128>}, {pipeline_mode = #tpu.pipeline_mode<synchronous>, transform_indices = @transform_15, window_bounds = array<i64: 128, 32>}, {pipeline_mode = #tpu.pipeline_mode<synchronous>, transform_indices = @transform_16, window_bounds = array<i64: 1, 32>}, {transform_indices = @transform_17, window_bounds = array<i64: 8, 32>}]} {
    %c0 = arith.constant 0 : index
    %c0_0 = arith.constant 0 : index
    %0 = vector.load %arg1[%c0, %c0_0] : memref<8x32xf32, #tpu.memory_space<vmem>>, vector<8x32xf32>
    %c0_1 = arith.constant 0 : index
    %c0_2 = arith.constant 0 : index
    %1 = vector.load %arg10[%c0_1, %c0_2] : memref<1x32xf32, #tpu.memory_space<vmem>>, vector<1x32xf32>
    %c0_3 = arith.constant 0 : index
    %c0_4 = arith.constant 0 : index
    %2 = vector.load %arg11[%c0_3, %c0_4] : memref<1x32xf32, #tpu.memory_space<vmem>>, vector<1x32xf32>
    %cst = arith.constant dense<0.000000e+00> : vector<8xf32>
    %3 = vector.multi_reduction <add>, %0, %cst [1] : vector<8x32xf32> to vector<8xf32>
    %4 = vector.shape_cast %3 : vector<8xf32> to vector<8x1xf32>
    %cst_5 = arith.constant 3.200000e+01 : f32
    %5 = vector.broadcast %cst_5 : f32 to vector<8x1xf32>
    %6 = arith.divf %4, %5 : vector<8x1xf32>
    %7 = vector.broadcast %6 : vector<8x1xf32> to vector<8x32xf32>
    %8 = arith.subf %0, %7 : vector<8x32xf32>
    %9 = arith.mulf %8, %8 : vector<8x32xf32>
    %cst_6 = arith.constant dense<0.000000e+00> : vector<8xf32>
    %10 = vector.multi_reduction <add>, %9, %cst_6 [1] : vector<8x32xf32> to vector<8xf32>
    %11 = vector.shape_cast %10 : vector<8xf32> to vector<8x1xf32>
    %cst_7 = arith.constant 3.200000e+01 : f32
    %12 = vector.broadcast %cst_7 : f32 to vector<8x1xf32>
    %13 = arith.divf %11, %12 : vector<8x1xf32>
    %14 = vector.broadcast %6 : vector<8x1xf32> to vector<8x32xf32>
    %15 = arith.subf %0, %14 : vector<8x32xf32>
    %cst_8 = arith.constant 9.99999974E-6 : f32
    %16 = vector.broadcast %cst_8 : f32 to vector<8x1xf32>
    %17 = arith.addf %13, %16 : vector<8x1xf32>
    %18 = math.sqrt %17 : vector<8x1xf32>
    %19 = vector.broadcast %18 : vector<8x1xf32> to vector<8x32xf32>
    %20 = arith.divf %15, %19 : vector<8x32xf32>
    %21 = vector.broadcast %1 : vector<1x32xf32> to vector<8x32xf32>
    %22 = arith.mulf %20, %21 : vector<8x32xf32>
    %23 = vector.broadcast %2 : vector<1x32xf32> to vector<8x32xf32>
    %24 = arith.addf %22, %23 : vector<8x32xf32>
    %c0_9 = arith.constant 0 : index
    %c0_10 = arith.constant 0 : index
    %25 = vector.load %arg2[%c0_9, %c0_10] : memref<32x32xf32, #tpu.memory_space<vmem>>, vector<32x32xf32>
    %cst_11 = arith.constant dense<0.000000e+00> : vector<8x32xf32>
    %26 = tpu.matmul %24, %25, %cst_11 {dimension_numbers = #tpu.dot_dimension_numbers<[1], [0], [0], [1], [0, 0, 1, 1], [], []>} : vector<8x32xf32>, vector<32x32xf32>, vector<8x32xf32> -> vector<8x32xf32>
    %c0_12 = arith.constant 0 : index
    %c0_13 = arith.constant 0 : index
    %27 = vector.load %arg3[%c0_12, %c0_13] : memref<1x32xf32, #tpu.memory_space<vmem>>, vector<1x32xf32>
    %28 = vector.broadcast %27 : vector<1x32xf32> to vector<8x32xf32>
    %29 = arith.addf %26, %28 : vector<8x32xf32>
    %c0_14 = arith.constant 0 : index
    %c0_15 = arith.constant 0 : index
    %30 = vector.load %arg4[%c0_14, %c0_15] : memref<32x32xf32, #tpu.memory_space<vmem>>, vector<32x32xf32>
    %cst_16 = arith.constant dense<0.000000e+00> : vector<8x32xf32>
    %31 = tpu.matmul %24, %30, %cst_16 {dimension_numbers = #tpu.dot_dimension_numbers<[1], [0], [0], [1], [0, 0, 1, 1], [], []>} : vector<8x32xf32>, vector<32x32xf32>, vector<8x32xf32> -> vector<8x32xf32>
    %c0_17 = arith.constant 0 : index
    %c0_18 = arith.constant 0 : index
    %32 = vector.load %arg5[%c0_17, %c0_18] : memref<1x32xf32, #tpu.memory_space<vmem>>, vector<1x32xf32>
    %33 = vector.broadcast %32 : vector<1x32xf32> to vector<8x32xf32>
    %34 = arith.addf %31, %33 : vector<8x32xf32>
    %c0_19 = arith.constant 0 : index
    %c0_20 = arith.constant 0 : index
    %35 = vector.load %arg6[%c0_19, %c0_20] : memref<32x32xf32, #tpu.memory_space<vmem>>, vector<32x32xf32>
    %cst_21 = arith.constant dense<0.000000e+00> : vector<8x32xf32>
    %36 = tpu.matmul %24, %35, %cst_21 {dimension_numbers = #tpu.dot_dimension_numbers<[1], [0], [0], [1], [0, 0, 1, 1], [], []>} : vector<8x32xf32>, vector<32x32xf32>, vector<8x32xf32> -> vector<8x32xf32>
    %c0_22 = arith.constant 0 : index
    %c0_23 = arith.constant 0 : index
    %37 = vector.load %arg7[%c0_22, %c0_23] : memref<1x32xf32, #tpu.memory_space<vmem>>, vector<1x32xf32>
    %38 = vector.broadcast %37 : vector<1x32xf32> to vector<8x32xf32>
    %39 = arith.addf %36, %38 : vector<8x32xf32>
    %40 = vector.shape_cast %29 : vector<8x32xf32> to vector<8x4x8xf32>
    %41 = tpu.transpose %40, [1, 0, 2] : vector<8x4x8xf32> -> vector<4x8x8xf32>
    %42 = vector.shape_cast %34 : vector<8x32xf32> to vector<8x4x8xf32>
    %43 = tpu.transpose %42, [1, 0, 2] : vector<8x4x8xf32> -> vector<4x8x8xf32>
    %44 = vector.shape_cast %39 : vector<8x32xf32> to vector<8x4x8xf32>
    %45 = tpu.transpose %44, [1, 0, 2] : vector<8x4x8xf32> -> vector<4x8x8xf32>
    %cst_24 = arith.constant dense<0.000000e+00> : vector<4x8x8xf32>
    %46 = tpu.matmul %41, %43, %cst_24 {dimension_numbers = #tpu.dot_dimension_numbers<[2], [2], [1], [1], [0, 0, 0, 1, 1, 1], [0], [0]>} : vector<4x8x8xf32>, vector<4x8x8xf32>, vector<4x8x8xf32> -> vector<4x8x8xf32>
    %cst_25 = arith.constant 8.000000e+00 : f32
    %47 = math.sqrt %cst_25 : f32
    %48 = vector.broadcast %47 : f32 to vector<4x8x8xf32>
    %49 = arith.divf %46, %48 : vector<4x8x8xf32>
    %50 = tpu.iota {dimensions = array<i32: 0>} : vector<8x8xi32>
    %51 = tpu.iota {dimensions = array<i32: 1>} : vector<8x8xi32>
    %52 = arith.cmpi sgt, %51, %50 : vector<8x8xi32>
    %53 = vector.shape_cast %52 : vector<8x8xi1> to vector<1x8x8xi1>
    %cst_26 = arith.constant -1.000000e+30 : f32
    %54 = vector.shape_cast %53 : vector<1x8x8xi1> to vector<1x8x8xi1>
    %55 = vector.broadcast %54 : vector<1x8x8xi1> to vector<4x8x8xi1>
    %56 = vector.broadcast %cst_26 : f32 to vector<4x8x8xf32>
    %57 = arith.select %55, %56, %49 : vector<4x8x8xi1>, vector<4x8x8xf32>
    %cst_27 = arith.constant dense<0xFF800000> : vector<4x8xf32>
    %58 = vector.multi_reduction <maximumf>, %57, %cst_27 [2] : vector<4x8x8xf32> to vector<4x8xf32>
    %59 = vector.shape_cast %58 : vector<4x8xf32> to vector<4x8x1xf32>
    %60 = vector.broadcast %59 : vector<4x8x1xf32> to vector<4x8x8xf32>
    %61 = arith.subf %57, %60 : vector<4x8x8xf32>
    %62 = math.exp %61 : vector<4x8x8xf32>
    %cst_28 = arith.constant dense<0.000000e+00> : vector<4x8xf32>
    %63 = vector.multi_reduction <add>, %62, %cst_28 [2] : vector<4x8x8xf32> to vector<4x8xf32>
    %64 = vector.shape_cast %63 : vector<4x8xf32> to vector<4x8x1xf32>
    %65 = vector.broadcast %64 : vector<4x8x1xf32> to vector<4x8x8xf32>
    %66 = arith.divf %62, %65 : vector<4x8x8xf32>
    %cst_29 = arith.constant dense<0.000000e+00> : vector<4x8x8xf32>
    %67 = tpu.matmul %66, %45, %cst_29 {dimension_numbers = #tpu.dot_dimension_numbers<[2], [1], [1], [2], [0, 0, 0, 1, 1, 2], [0], [0]>} : vector<4x8x8xf32>, vector<4x8x8xf32>, vector<4x8x8xf32> -> vector<4x8x8xf32>
    %68 = tpu.transpose %67, [1, 0, 2] : vector<4x8x8xf32> -> vector<8x4x8xf32>
    %69 = vector.shape_cast %68 : vector<8x4x8xf32> to vector<8x32xf32>
    %c0_30 = arith.constant 0 : index
    %c0_31 = arith.constant 0 : index
    %70 = vector.load %arg8[%c0_30, %c0_31] : memref<32x32xf32, #tpu.memory_space<vmem>>, vector<32x32xf32>
    %cst_32 = arith.constant dense<0.000000e+00> : vector<8x32xf32>
    %71 = tpu.matmul %69, %70, %cst_32 {dimension_numbers = #tpu.dot_dimension_numbers<[1], [0], [0], [1], [0, 0, 1, 1], [], []>} : vector<8x32xf32>, vector<32x32xf32>, vector<8x32xf32> -> vector<8x32xf32>
    %c0_33 = arith.constant 0 : index
    %c0_34 = arith.constant 0 : index
    %72 = vector.load %arg9[%c0_33, %c0_34] : memref<1x32xf32, #tpu.memory_space<vmem>>, vector<1x32xf32>
    %73 = vector.broadcast %72 : vector<1x32xf32> to vector<8x32xf32>
    %74 = arith.addf %71, %73 : vector<8x32xf32>
    %75 = arith.addf %74, %0 : vector<8x32xf32>
    %c0_35 = arith.constant 0 : index
    %c0_36 = arith.constant 0 : index
    %76 = vector.load %arg12[%c0_35, %c0_36] : memref<1x32xf32, #tpu.memory_space<vmem>>, vector<1x32xf32>
    %c0_37 = arith.constant 0 : index
    %c0_38 = arith.constant 0 : index
    %77 = vector.load %arg13[%c0_37, %c0_38] : memref<1x32xf32, #tpu.memory_space<vmem>>, vector<1x32xf32>
    %cst_39 = arith.constant dense<0.000000e+00> : vector<8xf32>
    %78 = vector.multi_reduction <add>, %75, %cst_39 [1] : vector<8x32xf32> to vector<8xf32>
    %79 = vector.shape_cast %78 : vector<8xf32> to vector<8x1xf32>
    %cst_40 = arith.constant 3.200000e+01 : f32
    %80 = vector.broadcast %cst_40 : f32 to vector<8x1xf32>
    %81 = arith.divf %79, %80 : vector<8x1xf32>
    %82 = vector.broadcast %81 : vector<8x1xf32> to vector<8x32xf32>
    %83 = arith.subf %75, %82 : vector<8x32xf32>
    %84 = arith.mulf %83, %83 : vector<8x32xf32>
    %cst_41 = arith.constant dense<0.000000e+00> : vector<8xf32>
    %85 = vector.multi_reduction <add>, %84, %cst_41 [1] : vector<8x32xf32> to vector<8xf32>
    %86 = vector.shape_cast %85 : vector<8xf32> to vector<8x1xf32>
    %cst_42 = arith.constant 3.200000e+01 : f32
    %87 = vector.broadcast %cst_42 : f32 to vector<8x1xf32>
    %88 = arith.divf %86, %87 : vector<8x1xf32>
    %89 = vector.broadcast %81 : vector<8x1xf32> to vector<8x32xf32>
    %90 = arith.subf %75, %89 : vector<8x32xf32>
    %cst_43 = arith.constant 9.99999974E-6 : f32
    %91 = vector.broadcast %cst_43 : f32 to vector<8x1xf32>
    %92 = arith.addf %88, %91 : vector<8x1xf32>
    %93 = math.sqrt %92 : vector<8x1xf32>
    %94 = vector.broadcast %93 : vector<8x1xf32> to vector<8x32xf32>
    %95 = arith.divf %90, %94 : vector<8x32xf32>
    %96 = vector.broadcast %76 : vector<1x32xf32> to vector<8x32xf32>
    %97 = arith.mulf %95, %96 : vector<8x32xf32>
    %98 = vector.broadcast %77 : vector<1x32xf32> to vector<8x32xf32>
    %99 = arith.addf %97, %98 : vector<8x32xf32>
    %c0_44 = arith.constant 0 : index
    %c0_45 = arith.constant 0 : index
    %100 = vector.load %arg14[%c0_44, %c0_45] : memref<32x128xf32, #tpu.memory_space<vmem>>, vector<32x128xf32>
    %cst_46 = arith.constant dense<0.000000e+00> : vector<8x128xf32>
    %101 = tpu.matmul %99, %100, %cst_46 {dimension_numbers = #tpu.dot_dimension_numbers<[1], [0], [0], [1], [0, 0, 1, 1], [], []>} : vector<8x32xf32>, vector<32x128xf32>, vector<8x128xf32> -> vector<8x128xf32>
    %c0_47 = arith.constant 0 : index
    %c0_48 = arith.constant 0 : index
    %102 = vector.load %arg15[%c0_47, %c0_48] : memref<1x128xf32, #tpu.memory_space<vmem>>, vector<1x128xf32>
    %103 = vector.broadcast %102 : vector<1x128xf32> to vector<8x128xf32>
    %104 = arith.addf %101, %103 : vector<8x128xf32>
    %cst_49 = arith.constant 5.000000e-01 : f32
    %105 = vector.broadcast %cst_49 : f32 to vector<8x128xf32>
    %106 = arith.mulf %105, %104 : vector<8x128xf32>
    %107 = arith.mulf %104, %104 : vector<8x128xf32>
    %108 = arith.mulf %107, %104 : vector<8x128xf32>
    %cst_50 = arith.constant 4.471500e-02 : f32
    %109 = vector.broadcast %cst_50 : f32 to vector<8x128xf32>
    %110 = arith.mulf %109, %108 : vector<8x128xf32>
    %111 = arith.addf %104, %110 : vector<8x128xf32>
    %cst_51 = arith.constant 0.797884583 : f32
    %112 = vector.broadcast %cst_51 : f32 to vector<8x128xf32>
    %113 = arith.mulf %112, %111 : vector<8x128xf32>
    %114 = math.tanh %113 : vector<8x128xf32>
    %cst_52 = arith.constant 1.000000e+00 : f32
    %115 = vector.broadcast %cst_52 : f32 to vector<8x128xf32>
    %116 = arith.addf %115, %114 : vector<8x128xf32>
    %117 = arith.mulf %106, %116 : vector<8x128xf32>
    %c0_53 = arith.constant 0 : index
    %c0_54 = arith.constant 0 : index
    %118 = vector.load %arg16[%c0_53, %c0_54] : memref<128x32xf32, #tpu.memory_space<vmem>>, vector<128x32xf32>
    %cst_55 = arith.constant dense<0.000000e+00> : vector<8x32xf32>
    %119 = tpu.matmul %117, %118, %cst_55 {dimension_numbers = #tpu.dot_dimension_numbers<[1], [0], [0], [1], [0, 0, 1, 1], [], []>} : vector<8x128xf32>, vector<128x32xf32>, vector<8x32xf32> -> vector<8x32xf32>
    %c0_56 = arith.constant 0 : index
    %c0_57 = arith.constant 0 : index
    %120 = vector.load %arg17[%c0_56, %c0_57] : memref<1x32xf32, #tpu.memory_space<vmem>>, vector<1x32xf32>
    %121 = vector.broadcast %120 : vector<1x32xf32> to vector<8x32xf32>
    %122 = arith.addf %119, %121 : vector<8x32xf32>
    %123 = arith.addf %122, %75 : vector<8x32xf32>
    %c0_58 = arith.constant 0 : index
    %c0_59 = arith.constant 0 : index
    %124 = vector.load %arg18[%c0_58, %c0_59] : memref<8x32xf32, #tpu.memory_space<vmem>>, vector<8x32xf32>
    tpu.vector_store %arg18[%c0_58, %c0_59], %123 {strides = array<i32>} : memref<8x32xf32, #tpu.memory_space<vmem>>, vector<8x32xf32>,
    return
  }
  func.func @transform_0(%arg0: i32) -> (i32, i32) {
    %c0_i32 = arith.constant 0 : i32
    %c0_i32_0 = arith.constant 0 : i32
    return %arg0, %c0_i32 : i32, i32
  }
  func.func @transform_1(%arg0: i32) -> (i32, i32) {
    %c0_i32 = arith.constant 0 : i32
    %c0_i32_0 = arith.constant 0 : i32
    %c0_i32_1 = arith.constant 0 : i32
    return %c0_i32, %c0_i32_0 : i32, i32
  }
  func.func @transform_2(%arg0: i32) -> (i32, i32) {
    %c0_i32 = arith.constant 0 : i32
    %c0_i32_0 = arith.constant 0 : i32
    %c0_i32_1 = arith.constant 0 : i32
    return %c0_i32, %c0_i32_0 : i32, i32
  }
  func.func @transform_3(%arg0: i32) -> (i32, i32) {
    %c0_i32 = arith.constant 0 : i32
    %c0_i32_0 = arith.constant 0 : i32
    %c0_i32_1 = arith.constant 0 : i32
    return %c0_i32, %c0_i32_0 : i32, i32
  }
  func.func @transform_4(%arg0: i32) -> (i32, i32) {
    %c0_i32 = arith.constant 0 : i32
    %c0_i32_0 = arith.constant 0 : i32
    %c0_i32_1 = arith.constant 0 : i32
    return %c0_i32, %c0_i32_0 : i32, i32
  }
  func.func @transform_5(%arg0: i32) -> (i32, i32) {
    %c0_i32 = arith.constant 0 : i32
    %c0_i32_0 = arith.constant 0 : i32
    %c0_i32_1 = arith.constant 0 : i32
    return %c0_i32, %c0_i32_0 : i32, i32
  }
  func.func @transform_6(%arg0: i32) -> (i32, i32) {
    %c0_i32 = arith.constant 0 : i32
    %c0_i32_0 = arith.constant 0 : i32
    %c0_i32_1 = arith.constant 0 : i32
    return %c0_i32, %c0_i32_0 : i32, i32
  }
  func.func @transform_7(%arg0: i32) -> (i32, i32) {
    %c0_i32 = arith.constant 0 : i32
    %c0_i32_0 = arith.constant 0 : i32
    %c0_i32_1 = arith.constant 0 : i32
    return %c0_i32, %c0_i32_0 : i32, i32
  }
  func.func @transform_8(%arg0: i32) -> (i32, i32) {
    %c0_i32 = arith.constant 0 : i32
    %c0_i32_0 = arith.constant 0 : i32
    %c0_i32_1 = arith.constant 0 : i32
    return %c0_i32, %c0_i32_0 : i32, i32
  }
  func.func @transform_9(%arg0: i32) -> (i32, i32) {
    %c0_i32 = arith.constant 0 : i32
    %c0_i32_0 = arith.constant 0 : i32
    %c0_i32_1 = arith.constant 0 : i32
    return %c0_i32, %c0_i32_0 : i32, i32
  }
  func.func @transform_10(%arg0: i32) -> (i32, i32) {
    %c0_i32 = arith.constant 0 : i32
    %c0_i32_0 = arith.constant 0 : i32
    %c0_i32_1 = arith.constant 0 : i32
    return %c0_i32, %c0_i32_0 : i32, i32
  }
  func.func @transform_11(%arg0: i32) -> (i32, i32) {
    %c0_i32 = arith.constant 0 : i32
    %c0_i32_0 = arith.constant 0 : i32
    %c0_i32_1 = arith.constant 0 : i32
    return %c0_i32, %c0_i32_0 : i32, i32
  }
  func.func @transform_12(%arg0: i32) -> (i32, i32) {
    %c0_i32 = arith.constant 0 : i32
    %c0_i32_0 = arith.constant 0 : i32
    %c0_i32_1 = arith.constant 0 : i32
    return %c0_i32, %c0_i32_0 : i32, i32
  }
  func.func @transform_13(%arg0: i32) -> (i32, i32) {
    %c0_i32 = arith.constant 0 : i32
    %c0_i32_0 = arith.constant 0 : i32
    %c0_i32_1 = arith.constant 0 : i32
    return %c0_i32, %c0_i32_0 : i32, i32
  }
  func.func @transform_14(%arg0: i32) -> (i32, i32) {
    %c0_i32 = arith.constant 0 : i32
    %c0_i32_0 = arith.constant 0 : i32
    %c0_i32_1 = arith.constant 0 : i32
    return %c0_i32, %c0_i32_0 : i32, i32
  }
  func.func @transform_15(%arg0: i32) -> (i32, i32) {
    %c0_i32 = arith.constant 0 : i32
    %c0_i32_0 = arith.constant 0 : i32
    %c0_i32_1 = arith.constant 0 : i32
    return %c0_i32, %c0_i32_0 : i32, i32
  }
  func.func @transform_16(%arg0: i32) -> (i32, i32) {
    %c0_i32 = arith.constant 0 : i32
    %c0_i32_0 = arith.constant 0 : i32
    %c0_i32_1 = arith.constant 0 : i32
    return %c0_i32, %c0_i32_0 : i32, i32
  }
  func.func @transform_17(%arg0: i32) -> (i32, i32) {
    %c0_i32 = arith.constant 0 : i32
    %c0_i32_0 = arith.constant 0 : i32
    return %arg0, %c0_i32 : i32, i32
  }
}

</mosaic_0001>

<bundles_post_ra>
// kernel: tpu_custom_call.1
= control target key start
LH: loop header
LB: loop body
LE: loop exit
PB: predicated region body
PF: predicated region fallthrough
CT: control target
= control target key end

     0   :  { %s3502_s0 = inlined_call_operand.hbm [shape: f32[16,32], index: 0, kind: input, shape index: {}]   ;;  %s3503_s1 = inlined_call_operand.vmem [shape: f32[32,32], index: 1, kind: input, shape index: {}]   ;;  %s3504_s2 = inlined_call_operand.vmem [shape: f32[1,32], index: 2, kind: input, shape index: {}]   ;;  %s3505_s3 = inlined_call_operand.vmem [shape: f32[32,32], index: 3, kind: input, shape index: {}]   ;;  %s3506_s4 = inlined_call_operand.vmem [shape: f32[1,32], index: 4, kind: input, shape index: {}]   ;;  %s3507_s5 = inlined_call_operand.vmem [shape: f32[32,32], index: 5, kind: input, shape index: {}]   ;;  %s3508_s6 = inlined_call_operand.vmem [shape: f32[1,32], index: 6, kind: input, shape index: {}]   ;;  %s3509_s7 = inlined_call_operand.vmem [shape: f32[32,32], index: 7, kind: input, shape index: {}]   ;;  %s3510_s8 = inlined_call_operand.vmem [shape: f32[1,32], index: 8, kind: input, shape index: {}]   ;;  %s3511_s9 = inlined_call_operand.vmem [shape: f32[1,32], index: 9, kind: input, shape index: {}]   ;;  %s3512_s10 = inlined_call_operand.vmem [shape: f32[1,32], index: 10, kind: input, shape index: {}]   ;;  %s3513_s11 = inlined_call_operand.vmem [shape: f32[1,32], index: 11, kind: input, shape index: {}]   ;;  %s3514_s12 = inlined_call_operand.vmem [shape: f32[1,32], index: 12, kind: input, shape index: {}]   ;;  %s3515_s13 = inlined_call_operand.vmem [shape: f32[32,128], index: 13, kind: input, shape index: {}]   ;;  %s3516_s14 = inlined_call_operand.vmem [shape: f32[1,128], index: 14, kind: input, shape index: {}]   ;;  %s3517_s15 = inlined_call_operand.vmem [shape: f32[128,32], index: 15, kind: input, shape index: {}]   ;;  %s3518_s16 = inlined_call_operand.vmem [shape: f32[1,32], index: 16, kind: input, shape index: {}]   ;;  %s3519_s17 = inlined_call_operand.hbm [shape: f32[16,32], index: 17, kind: output, shape index: {}]  }
   0x1   :  { %3533 = sst [smem:[#allocation15_spill]] %s3502_s0 }
   0x2   :  { %3534 = sst [smem:[#allocation16_spill]] %s3503_s1 }
   0x3   :  { %3535 = sst [smem:[#allocation17_spill]] %s3504_s2 }
   0x4   :  { %3536 = sst [smem:[#allocation18_spill]] %s3505_s3 }
   0x5   :  { %3537 = sst [smem:[#allocation19_spill]] %s3506_s4 }
   0x6   :  { %3538 = sst [smem:[#allocation20_spill]] %s3518_s16 }
   0x7   :  { %3539 = sst [smem:[#allocation21_spill]] %s3519_s17 }
   0x8   :  { %22 = vsyncpa [#allocation3], 0 }
   0x9   :  { %24 = vsyncpa [#allocation3 + $0x1], 0 }
   0xa   :  { %25 = vsyncpa [#allocation4], 0 }
   0xb   :  { %27 = vsyncpa [#allocation4 + $0x1], 0  ;;  %s3003_s24 = smov 0   ;;  %s3005_s25 = smov 0  }
   0xc   :  { %s3007_s26 = smov 0   ;;  %s3009_s27 = smov 0  }
   0xd LB: > { %3540 = sst [smem:[#allocation8_spill]] %s2887_s24  ;;  %s3024_s28 = sadd.s32 4294967295, %s2899_s27   ;;  %s2899_s27 = sphi %s3009_s27, %s3570_s27   ;;  %s2895_s26 = sphi %s3007_s26, %s3572_s26   ;;  %s2891_s25 = sphi %s3005_s25, %s3574_s25   ;;  %s2887_s24 = sphi %s3003_s24, %s3573_s24  }
   0xe   : > { %3541 = sst [smem:[#allocation9_spill]] %s2895_s26  ;;  %s2490_s29 = sadd.s32 4294967294, %s2899_s27  }
   0xf   : > { %3542 = sst [smem:[#allocation10_spill]] %s3024_s28  ;;  %s3028_s0 = sadd.s32 1, %s2899_s27  }
  0x10   : > { %3543 = sst [smem:[#allocation11_spill]] %s3028_s0  ;;  %s40_s30 = sadd.s32 1, %s2895_s26 }
  0x11   : > { %s37_s18 = ssub.s32 %s2899_s27, %s3028_s0  ;;  %p47_p0 = scmp.ne.s32.totalorder %s2895_s26, %s2891_s25 }
  0x12   : > { %p38_p1 = scmp.eq.s32.totalorder %s37_s18, 0  ;;  %p48_p2 = scmp.eq.s32.totalorder %s2899_s27, 0 }
  0x13   : > { %p53_p3 = scmp.ne.s32.totalorder %s2891_s25, %s2887_s24  ;;  %p54_p4 = scmp.eq.s32.totalorder %s3024_s28, 0 }
  0x14   : > { %s3040_s19 = scalar_select %p38_p1, %s2895_s26, %s40_s30  }
  0x15   : > { %p3042_p5 = por %p48_p2, %p47_p0  ;;  %p3046_p6 = por %p54_p4, %p53_p3 }
  0x16   : > { %3544 = sst [smem:[#allocation12_spill]] %s3040_s19  ;;  %p413_p7 = scmp.eq.s32.totalorder %s3024_s28, 1 }
  0x17   : > { %s3546_s20 = scalar_select %p3046_p6, 1, 0 }
  0x18   : > { %p419_p8 = scmp.eq.s32.totalorder %s2490_s29, 1  ;;  %p2737_p10 = scmp.lt.s32.totalorder %s2899_s27, 2 }
  0x19   : > { %p3053_p11 = por %p413_p7, %p47_p0  ;;  %s487_s23 = sand.u32 1, %s2895_s26  }
  0x1a   : > { %p3057_p12 = por %p419_p8, %p53_p3  ;;  %s2494_s30 = sshll.u32 %s2899_s27, 7 }
  0x1b   : > { %s3547_s21 = scalar_select %p3053_p11, 1, 0 }
  0x1c   : > { %s3549_s22 = scalar_select %p3057_p12, 1, 0 }
  0x1d   : > { %3548 = sst [smem:[#allocation13_spill]] %s3547_s21  ;;  %s2493_s18 = sshll.u32 %s487_s23, 3 }
  0x1e   : > { %3550 = sst [smem:[#allocation14_spill]] %s3549_s22  ;;  %s491_s29 = scalar_lea.vmem [#allocation2], %s2493_s18 }
  0x1f   : > { %s3551_s24 = sld [smem:[#allocation15_spill]]  ;;  %s498_s28 = sshll.u32 %s491_s29, 4  ;;  %s3074_s28 = int_to_ptr.vmem [resolvable:$true] %s498_s28 }
  0x20   : > { %p3070_p13 = pnand %p2737_p10, %p3042_p5  ;;  %s488_s26 = scalar_lea.sflag [#allocation3], %s487_s23 }
  0x22   : > { %p2809_p3 = pneg %p3070_p13 }
  0x25   : > { %s3552_s17 = smov %s3551_s24  ;;  %s3066_s16 = scalar_lea.hbm %s3551_s24, %s2494_s30 }
  0x26   : > { %s2807_s22 = scalar_lea.hbm %s3066_s16, 128  ;;  %s2812_s19 = scalar_lea.hbm %s3552_s17, 256 }
  0x27   : > { %p2808_p2 = scmp.ne.s32.totalorder %s3066_s16, %s2807_s22  ;;  %p2813_p5 = scmp.lt.s32.totalorder %s3066_s16, %s3552_s17 }
  0x28   : > { %p2814_p8 = scmp.lt.s32.totalorder %s2812_s19, %s2807_s22 }
  0x29   : > { %p2810_p4 = pnand %p2809_p3, %p2808_p2 }
  0x2a   : > { %p2815_p10 = por %p2814_p8, %p2813_p5 }
  0x2b   : > { %p2811_p7 = pneg %p2810_p4 }
  0x2d   : > { %p2816_p9 = pnand %p2815_p10, %p2811_p7 }
  0x2f   : > { %2819 = shalt.err (!%p2816_p9)
}
  0x30   : > { %s2820_s23 = scalar_lea.vmem %s3074_s28, 128  ;;  %s2901_s18 = smov [#allocation2]  }
  0x31   : > { %p2821_p0 = scmp.ne.s32.totalorder %s3074_s28, %s2820_s23  ;;  %s2825_s29 = sshll.u32 %s2901_s18, 4  ;;  %s2826_s29 = int_to_ptr.vmem [resolvable:$false] %s2825_s29 }
  0x32   : > { %s2827_s24 = scalar_lea.vmem %s2826_s29, 256  ;;  %p2828_p4 = scmp.lt.s32.totalorder %s3074_s28, %s2826_s29 }
  0x33   : > { %p2823_p1 = pnand %p2821_p0, %p2809_p3  ;;  %p2829_p12 = scmp.lt.s32.totalorder %s2827_s24, %s2820_s23 }
  0x35   : > { %p2824_p2 = pneg %p2823_p1  ;;  %p2830_p11 = por %p2829_p12, %p2828_p4 }
  0x37   : > { %p2831_p6 = pnand %p2830_p11, %p2824_p2 }
  0x39   : > { %2834 = shalt.err (!%p2831_p6)
}
  0x3a   : > { %2732 = dma.hbm_to_vmem [thread:$0]  (!%p3070_p13), %s3066_s16, 128, %s3074_s28, %s488_s26  }
  0x3b   : > { %p3554_p9 = scmp.lt.s32.totalorder %s2899_s27, 3  ;;  %p3555_p7 = scmp.ge.s32.totalorder %s2899_s27, 1 }
  0x3d   : > { %p504_p0 = pnand %p3555_p7, %p3554_p9 }
  0x3e   : > { %s3101_s22 = sand.u32 (!%p504_p0), 1, %s2891_s25   ;;  %p3556_p6 = scmp.ne.s32.totalorder (!%p504_p0), %s3546_s20, 0 }
  0x3f   : > { %507 = sbr.rel (%p504_p0) target bundleno = 2563 (0xa03), region = 88  ;;  %s2496_s0 = sshll.u32 (!%p504_p0), %s3101_s22, 3 }
  0x40   : > { %s510_s19 = scalar_lea.sflag (!%p504_p0), [#allocation3], %s3101_s22  ;;  %s513_s21 = scalar_lea.vmem (!%p504_p0), [#allocation2], %s2496_s0 }
  0x44   : > { %2878 = dma.done.wait (%p3556_p6), %s510_s19, 128  }
  0x45   : > { %2880 = vsyncadd (%p3556_p6), %s510_s19, 4294967168  ;;  %vm567_vm0 = vcmask 261120   ;;  %v3111_v0 = vld [vmem:[%s513_s21] sm:$0xff]  ;;  %s3557_s28 = sld [smem:[#allocation16_spill]]  ;;  %v2902_v8 = vmov 0.0   ;;  %vm2903_vm1 = vmmov 0   ;;  %v864_v46 = vlaneseq }
  0x46   : > { %v568_v1 = vsel %vm567_vm0, %v3111_v0, 0.0  ;;  %2595 = vmatprep.subr.mxu1 %v2902_v8  ;;  %2603 = vmatprep.mubr.msk.f32.mxu1 %vm2903_vm1, %v2902_v8  ;;  %v2498_v21 = vld [vmem:[%s3511_s9] ss:$0 sm:$0xff]  ;;  %s3558_s3 = sld [smem:[#allocation18_spill]]  ;;  %v771_v30 = vld [vmem:[%s3507_s5 + $0x18] sm:$0xff]  ;;  %v770_v31 = vld [vmem:[%s3507_s5 + $0x10] sm:$0xff] }
  0x47   : > { %569 = vadd.xlane.f32.xlu0 %v568_v1  ;;  %2638 = vmatprep.subr.mxu0 %v2902_v8  ;;  %v2499_v23 = vld [vmem:[%s3512_s10] ss:$0 sm:$0xff]  ;;  %v769_v32 = vld [vmem:[%s3507_s5 + $0x8] sm:$0xff]  ;;  %s3559_s4 = sld [smem:[#allocation19_spill]]  ;;  %s2904_s24 = smov 104   ;;  %v3201_v50 = vshrl.u32 %v864_v46, 7 }
  0x48   : > { %2640 = vmatprep.mubr.msk.f32.mxu0 %vm2903_vm1, %v2902_v8  ;;  %v768_v33 = vld [vmem:[%s3507_s5] sm:$0xff]  ;;  %s2905_s19 = smov 120   ;;  %s3560_s2 = sld [smem:[#allocation17_spill]]  ;;  %v2907_v44 = vmov 1983009808   ;;  %vm1287_vm4 = vcmask 64512  }
  0x49   : > { %s2906_s26 = smov 112   ;;  %v862_v45 = vunpack.c.l.s4 %v2907_v44  ;;  %v2908_v47 = vmov 1934713408   ;;  %s2910_s20 = smov 8   ;;  %vm2093_vm6 = vcmask 130048   ;;  %vm2095_vm7 = vcmask 195584  }
  0x4a   : > { %v894_v48 = vunpack.c.l.s4 %v2908_v47  ;;  %s2911_s1 = smov 24   ;;  %s3564_s29 = sld [smem:[#allocation21_spill]] }
  0x4b   : > { %v606_v7 = vld [vmem:[%s3557_s28 + $0x18] sm:$0xff]  ;;  %v605_v9 = vld [vmem:[%s3557_s28 + $0x10] sm:$0xff]  ;;  %v604_v10 = vld [vmem:[%s3557_s28 + $0x8] sm:$0xff]  ;;  %v863_v49 = vunpack.c.0.s8 %v862_v45 }
  0x4c   : > { %2596 = vmatpush3.msra.mxu1 %v606_v7  ;;  %v603_v11 = vld [vmem:[%s3557_s28] sm:$0xff]  ;;  %v690_v26 = vld [vmem:[%s3558_s3 + $0x18] sm:$0xff]  ;;  %v689_v27 = vld [vmem:[%s3558_s3 + $0x10] sm:$0xff]  ;;  %v895_v53 = vunpack.c.0.s8 %v894_v48 }
  0x4d   : > { %2597 = vmatprep.subr.mxu1 %v2902_v8  ;;  %v688_v28 = vld [vmem:[%s3558_s3 + $0x8] sm:$0xff]  ;;  %v687_v29 = vld [vmem:[%s3558_s3] sm:$0xff]  ;;  %v3204_v54 = vsub.s32 %v863_v49, %v3201_v50  ;;  %s2407_s3 = scalar_lea.sflag [#allocation4], %s3101_s22 }
  0x4e   : > { %2598 = vmatpush3.msra.mxu1 %v605_v9  ;;  %v2502_v36 = vld [vmem:[%s3559_s4] ss:$0 sm:$0xff]  ;;  %v3207_v60 = vsub.s32 %v895_v53, %v3201_v50 }
  0x4f   : > { %2599 = vmatprep.subr.mxu1 %v2902_v8  ;;  %v2500_v40 = vld [vmem:[%s3560_s2] ss:$0 sm:$0xff] }
  0x50   : > { %2600 = vmatpush3.msra.mxu1 %v604_v10 }
  0x51   : > { %2601 = vmatprep.subr.mxu1 %v2902_v8 }
  0x52   : > { %2602 = vmatpush3.msra.mxu1 %v603_v11 }
  0x53   : > { %2606 = vmatprep.subr.mxu1 %v2902_v8 }
  0xd0   : > { %v570_v2 = vpop.xlane.xlu0 %569 }
  0xd1   : > { %v572_v3 = vmul.f32 0.03125, %v570_v2 }
  0xd3   : > { %v573_v4 = vsub.f32 %v3111_v0, %v572_v3 }
  0xd5   : > { %v574_v5 = vmul.f32 %v573_v4, %v573_v4 }
  0xd7   : > { %v575_v6 = vsel %vm567_vm0, %v574_v5, 0.0 }
  0xd8   : > { %576 = vadd.xlane.f32.xlu0 %v575_v6 }
 0x161   : > { %v577_v12 = vpop.xlane.xlu0 %576 }
 0x162   : > { %v578_v13 = vmul.f32 0.03125, %v577_v12 }
 0x164   : > { %v579_v14 = vadd.f32 1e-05, %v578_v13 }
 0x166   : > { %2781 = vrsqrt.f32 %v579_v14  ;;  %vm582_vm2 = vcmp.eq.f32.partialorder %v579_v14, inf  ;;  %v585_v17 = vand.u32 2147483648, %v579_v14  ;;  %vm584_vm3 = vcmp.eq.f32.partialorder %v579_v14, 0.0 }
 0x173   : > { %v2782_v15 = vpop.eup %2781 }
 0x174   : > { %v581_v16 = vmul.f32 %v2782_v15, %v579_v14 }
 0x176   : > { %v583_v18 = vsel %vm582_vm2, %v579_v14, %v581_v16 }
 0x177   : > { %v586_v19 = vsel %vm584_vm3, %v585_v17, %v583_v18 }
 0x178   : > { %2783 = vrcp.f32 %v586_v19 }
 0x185   : > { %v2784_v20 = vpop.eup %2783 }
 0x186   : > { %v588_v22 = vmul.f32 %v2784_v20, %v573_v4 }
 0x188   : > { %v595_v24 = vmul.f32 %v2498_v21, %v588_v22 }
 0x18a   : > { %v602_v25 = vadd.f32 %v2499_v23, %v595_v24 }
 0x18c   : > { %2604 = vmatmul.mubr.msk.f32.vlgmr.msra.gmra.mxu1 %vm567_vm0, %v602_v25 }
 0x18d   : > { %2607 = vmatpush3.msra.mxu1 %v690_v26  ;;  %2614 = vmatprep.mubr.msk.f32.mxu1 %vm2903_vm1, %v2902_v8 }
 0x18e   : > { %2608 = vmatprep.subr.mxu1 %v2902_v8 }
 0x18f   : > { %2609 = vmatpush3.msra.mxu1 %v689_v27 }
 0x190   : > { %2610 = vmatprep.subr.mxu1 %v2902_v8 }
 0x191   : > { %2611 = vmatpush3.msra.mxu1 %v688_v28 }
 0x192   : > { %2612 = vmatprep.subr.mxu1 %v2902_v8 }
 0x193   : > { %2613 = vmatpush3.msra.mxu1 %v687_v29 }
 0x194   : > { %2615 = vmatmul.mubr.msk.f32.vlgmr.msra.gmra.mxu1 %vm567_vm0, %v602_v25  ;;  %2617 = vmatprep.subr.mxu1 %v2902_v8 }
 0x195   : > { %2618 = vmatpush3.msra.mxu1 %v771_v30  ;;  %2625 = vmatprep.mubr.msk.f32.mxu1 %vm2903_vm1, %v2902_v8 }
 0x196   : > { %2619 = vmatprep.subr.mxu1 %v2902_v8 }
 0x197   : > { %2620 = vmatpush3.msra.mxu1 %v770_v31 }
 0x198   : > { %2621 = vmatprep.subr.mxu1 %v2902_v8 }
 0x199   : > { %2622 = vmatpush3.msra.mxu1 %v769_v32 }
 0x19a   : > { %2623 = vmatprep.subr.mxu1 %v2902_v8 }
 0x19b   : > { %2624 = vmatpush3.msra.mxu1 %v768_v33 }
 0x19c   : > { %2626 = vmatmul.mubr.msk.f32.vlgmr.msra.gmra.mxu1 %vm567_vm0, %v602_v25  ;;  %2628 = vmatprep.subr.mxu1 %v2902_v8 }
 0x19d   : > { %2630 = vmatprep.mubr.msk.f32.mxu1 %vm2903_vm1, %v2902_v8 }
 0x24c   : > { %v683_v34 = vpop.f32.mrf.mxu1 }
 0x24d   : > { %v684_v42 = vadd.f32 %v2500_v40, %v683_v34 }
 0x24e   : > { %v2605_v35 = vpop.f32.mrf.mxu1 }
 0x254   : > { %v764_v37 = vpop.f32.mrf.mxu1 }
 0x255   : > { %v765_v38 = vadd.f32 %v2502_v36, %v764_v37 }
 0x256   : > { %v2616_v39 = vpop.f32.mrf.mxu1 }
 0x257   : > { %1002 = vrot.lane.b32.xlu0 %v765_v38, %s2904_s24  ;;  %996 = vrot.lane.b32.xlu1 %v765_v38, %s2905_s19 }
 0x25b   : > { %999 = vrot.lane.b32.xlu1 %v765_v38, %s2906_s26 }
 0x25c   : > { %v3195_v41 = vpop.f32.mrf.mxu1 }
 0x25e   : > { %v2627_v43 = vpop.f32.mrf.mxu1 }
 0x25f   : > { %850 = vrot.lane.b32.xlu1 %v684_v42, %s2905_s19 }
 0x263   : > { %853 = vrot.lane.b32.xlu1 %v684_v42, %s2906_s26 }
 0x267   : > { %856 = vrot.lane.b32.xlu1 %v684_v42, %s2904_s24 }
 0x2c9   : > { %v1003_v51 = vpop.permute.xlu0 %1002  ;;  %v997_v52 = vpop.permute.xlu1 %996 }
 0x2ca   : > { %v1021_v55 = vcombine.low %v997_v52, %v1003_v51  ;;  %v1022_v56 = vcombine.high %v997_v52, %v1003_v51 }
 0x2cc   : > { %v1029_v61 = vrot.slane %v1021_v55, %v3204_v54  ;;  %v1036_v62 = vrot.slane %v1022_v56, %v3204_v54 }
 0x2cd   : > { %v1000_v57 = vpop.permute.xlu1 %999 }
 0x2ce   : > { %v1005_v58 = vcombine.low %v765_v38, %v1000_v57  ;;  %v1006_v59 = vcombine.high %v765_v38, %v1000_v57 }
 0x2d0   : > { %v1013_v63 = vrot.slane %v1005_v58, %v3204_v54  ;;  %v1020_v1 = vrot.slane %v1006_v59, %v3204_v54 }
 0x2d1   : > { %v851_v2 = vpop.permute.xlu1 %850 }
 0x2d2   : > { %v1037_v3 = vcombine.low %v1013_v63, %v1029_v61  ;;  %v1038_v4 = vcombine.high %v1013_v63, %v1029_v61  ;;  %v1053_v5 = vcombine.low %v1020_v1, %v1036_v62  ;;  %v1054_v6 = vcombine.high %v1020_v1, %v1036_v62 }
 0x2d4   : > { %v1045_v7 = vrot.slane %v1037_v3, %v3207_v60  ;;  %v1052_v9 = vrot.slane %v1038_v4, %v3207_v60  ;;  %v1061_v10 = vrot.slane %v1053_v5, %v3207_v60  ;;  %v1068_v11 = vrot.slane %v1054_v6, %v3207_v60 }
 0x2d5   : > { %v854_v12 = vpop.permute.xlu1 %853 }
 0x2d6   : > { %v1073_v13 = vcombine.low %v1045_v7, %v1052_v9  ;;  %v2508_v14 = vcombine.high %v1045_v7, %v1052_v9  ;;  %v1089_v15 = vcombine.low %v1061_v10, %v1068_v11  ;;  %v2509_v16 = vcombine.high %v1061_v10, %v1068_v11 }
 0x2d7   : > { %v859_v17 = vcombine.low %v684_v42, %v854_v12  ;;  %v860_v18 = vcombine.high %v684_v42, %v854_v12 }
 0x2d8   : > { %v1080_v19 = vrot.slane %v1073_v13, %v3204_v54  ;;  %v1088_v20 = vrot.slane %v2508_v14, %v3204_v54  ;;  %v1096_v21 = vrot.slane %v1089_v15, %v3204_v54  ;;  %v1104_v22 = vrot.slane %v2509_v16, %v3204_v54 }
 0x2d9   : > { %v857_v23 = vpop.permute.xlu1 %856  ;;  %v867_v28 = vrot.slane %v859_v17, %v3204_v54  ;;  %v874_v29 = vrot.slane %v860_v18, %v3204_v54  ;;  %v1600_v13 = vand.u32 127, %v864_v46 }
 0x2da   : > { %v1105_v24 = vcombine.low %v1080_v19, %v1088_v20  ;;  %v1121_v25 = vcombine.low %v1096_v21, %v1104_v22  ;;  %v875_v26 = vcombine.low %v851_v2, %v857_v23  ;;  %v876_v27 = vcombine.high %v851_v2, %v857_v23 }
 0x2db   : > { %v1106_v30 = vcombine.high %v1080_v19, %v1088_v20  ;;  %v1122_v31 = vcombine.high %v1096_v21, %v1104_v22  ;;  %vm1601_vm5 = vcmp.gt.s32.totalorder %v1600_v13, %v3201_v50 }
 0x2dc   : > { %v883_v32 = vrot.slane %v875_v26, %v3204_v54  ;;  %v890_v33 = vrot.slane %v876_v27, %v3204_v54  ;;  %v1113_v34 = vrot.slane %v1105_v24, %v3207_v60  ;;  %v1129_v35 = vrot.slane %v1121_v25, %v3207_v60 }
 0x2dd   : > { %v1120_v36 = vrot.slane %v1106_v30, %v3207_v60  ;;  %v1136_v37 = vrot.slane %v1122_v31, %v3207_v60 }
 0x2de   : > { %v891_v38 = vcombine.low %v867_v28, %v883_v32  ;;  %v892_v39 = vcombine.high %v867_v28, %v883_v32  ;;  %v907_v40 = vcombine.low %v874_v29, %v890_v33  ;;  %v908_v42 = vcombine.high %v874_v29, %v890_v33  ;;  %v2504_v33 = vld [vmem:[%s3508_s6] ss:$0 sm:$0xff] }
 0x2df   : > { %v1137_v43 = vcombine.low %v1113_v34, %v1129_v35  ;;  %v1139_v44 = vcombine.low %v1120_v36, %v1136_v37  ;;  %v1138_v9 = vcombine.high %v1113_v34, %v1129_v35  ;;  %v1140_v11 = vcombine.high %v1120_v36, %v1136_v37 }
 0x2e0   : > { %v899_v45 = vrot.slane %v891_v38, %v3207_v60  ;;  %v906_v47 = vrot.slane %v892_v39, %v3207_v60  ;;  %v915_v48 = vrot.slane %v907_v40, %v3207_v60  ;;  %v922_v49 = vrot.slane %v908_v42, %v3207_v60 }
 0x2e1   : > { %2629 = vmatpush3.xpose.msk.msra.mxu1 %vm1287_vm4, %v1137_v43  ;;  %2639 = vmatpush3.xpose.msk.msra.mxu0 %vm1287_vm4, %v1139_v44  ;;  %v846_v34 = vadd.f32 %v2504_v33, %v3195_v41 }
 0x2e2   : > { %v927_v51 = vcombine.low %v899_v45, %v906_v47  ;;  %v2506_v52 = vcombine.high %v899_v45, %v906_v47  ;;  %v943_v53 = vcombine.low %v915_v48, %v922_v49  ;;  %v2507_v55 = vcombine.high %v915_v48, %v922_v49  ;;  %2633 = vmatprep.subr.mxu1 %v2902_v8 }
 0x2e3   : > { %2648 = vmatprep.subr.mxu0 %v2902_v8 }
 0x2e4   : > { %v934_v56 = vrot.slane %v927_v51, %v3204_v54  ;;  %v942_v57 = vrot.slane %v2506_v52, %v3204_v54  ;;  %v950_v58 = vrot.slane %v943_v53, %v3204_v54  ;;  %v958_v59 = vrot.slane %v2507_v55, %v3204_v54 }
 0x2e6   : > { %v959_v61 = vcombine.low %v934_v56, %v942_v57  ;;  %v975_v62 = vcombine.low %v950_v58, %v958_v59  ;;  %v960_v63 = vcombine.high %v934_v56, %v942_v57  ;;  %v976_v1 = vcombine.high %v950_v58, %v958_v59 }
 0x2e8   : > { %v967_v2 = vrot.slane %v959_v61, %v3207_v60  ;;  %v983_v3 = vrot.slane %v975_v62, %v3207_v60  ;;  %v974_v4 = vrot.slane %v960_v63, %v3207_v60  ;;  %v990_v5 = vrot.slane %v976_v1, %v3207_v60 }
 0x2ea   : > { %v991_v6 = vcombine.low %v967_v2, %v983_v3  ;;  %v993_v7 = vcombine.low %v974_v4, %v990_v5  ;;  %v992_v10 = vcombine.high %v967_v2, %v983_v3  ;;  %v994_v12 = vcombine.high %v974_v4, %v990_v5 }
 0x2ec   : > { %2631 = vmatmul.mubr.msk.f32.vlgmr.msra.gmra.mxu1 %vm1287_vm4, %v991_v6  ;;  %2641 = vmatmul.mubr.msk.f32.vlgmr.msra.gmra.mxu0 %vm1287_vm4, %v993_v7 }
 0x2ed   : > { %2634 = vmatpush3.xpose.msk.msra.mxu1 %vm1287_vm4, %v1138_v9  ;;  %2635 = vmatprep.mubr.msk.f32.mxu1 %vm2903_vm1, %v2902_v8 }
 0x2ee   : > { %2643 = vmatprep.subr.mxu1 %v2902_v8  ;;  %2650 = vmatprep.mubr.msk.f32.mxu0 %vm2903_vm1, %v2902_v8 }
 0x2f0   : > { %2636 = vmatmul.mubr.msk.f32.vlgmr.msra.gmra.mxu1 %vm1287_vm4, %v992_v10 }
 0x2f1   : > { %2644 = vmatpush3.xpose.msk.msra.mxu1 %vm1287_vm4, %v1140_v11  ;;  %2645 = vmatprep.mubr.msk.f32.mxu1 %vm2903_vm1, %v2902_v8 }
 0x2f2   : > { %2653 = vmatprep.subr.mxu1 %v2902_v8 }
 0x2f4   : > { %2646 = vmatmul.mubr.msk.f32.vlgmr.msra.gmra.mxu1 %vm1287_vm4, %v994_v12 }
 0x2f5   : > { %2655 = vmatprep.mubr.msk.f32.mxu1 %vm2903_vm1, %v2902_v8 }
 0x3ac   : > { %v1360_v14 = vpop.f32.mrf.mxu1  ;;  %v1512_v15 = vpop.f32.mrf.mxu0 }
 0x3ad   : > { %v1593_v16 = vmul.f32 0.35355338, %v1360_v14  ;;  %v1595_v17 = vmul.f32 0.35355338, %v1512_v15 }
 0x3ae   : > { %v2632_v18 = vpop.f32.mrf.mxu1  ;;  %v2642_v19 = vpop.f32.mrf.mxu0 }
 0x3af   : > { %v1604_v20 = vsel %vm1601_vm5, -1e+30, %v1593_v16  ;;  %v1606_v24 = vsel %vm1601_vm5, -1e+30, %v1595_v17 }
 0x3b0   : > { %v1436_v21 = vpop.f32.mrf.mxu1  ;;  %v1608_v22 = vsel %vm1287_vm4, %v1604_v20, -inf  ;;  %v1614_v27 = vsel %vm1287_vm4, %v1606_v24, -inf }
 0x3b1   : > { %v1594_v23 = vmul.f32 0.35355338, %v1436_v21  ;;  %1609 = vmax.xlane.f32.xlu1 %v1608_v22 }
 0x3b2   : > { %v2637_v46 = vpop.f32.mrf.mxu1 }
 0x3b3   : > { %v1605_v25 = vsel %vm1601_vm5, -1e+30, %v1594_v23 }
 0x3b4   : > { %v1588_v26 = vpop.f32.mrf.mxu1  ;;  %v1611_v28 = vsel %vm1287_vm4, %v1605_v25, -inf }
 0x3b5   : > { %v1596_v29 = vmul.f32 0.35355338, %v1588_v26  ;;  %1615 = vmax.xlane.f32.xlu1 %v1614_v27  ;;  %1612 = vmax.xlane.f32.xlu0 %v1611_v28 }
 0x3b6   : > { %v2647_v30 = vpop.f32.mrf.mxu1 }
 0x3b7   : > { %v1607_v31 = vsel %vm1601_vm5, -1e+30, %v1596_v29 }
 0x3b8   : > { %v1617_v32 = vsel %vm1287_vm4, %v1607_v31, -inf }
 0x3b9   : > { %1618 = vmax.xlane.f32.xlu1 %v1617_v32 }
 0x3ca   : > { %1145 = vrot.lane.b32.xlu1 %v846_v34, %s2906_s26  ;;  %s2909_s26 = smov 16  }
 0x43a   : > { %v1610_v35 = vpop.xlane.xlu1 %1609 }
 0x43b   : > { %v1620_v36 = vsub.f32 %v1604_v20, %v1610_v35 }
 0x43d   : > { %v1624_v37 = vmul.f32 1.442695, %v1620_v36 }
 0x43e   : > { %v1616_v38 = vpop.xlane.xlu1 %1615  ;;  %v1613_v39 = vpop.xlane.xlu0 %1612 }
 0x43f   : > { %2785 = vpow2.f32 %v1624_v37  ;;  %v1622_v40 = vsub.f32 %v1606_v24, %v1616_v38  ;;  %v1621_v50 = vsub.f32 %v1605_v25, %v1613_v39 }
 0x441   : > { %v1628_v42 = vmul.f32 1.442695, %v1622_v40  ;;  %v1626_v43 = vmul.f32 1.442695, %v1621_v50 }
 0x442   : > { %v1619_v44 = vpop.xlane.xlu1 %1618 }
 0x443   : > { %2787 = vpow2.f32 %v1628_v42  ;;  %v1623_v45 = vsub.f32 %v1607_v31, %v1619_v44 }
 0x444   : > { %2789 = vpow2.f32 %v1626_v43 }
 0x445   : > { %v1630_v47 = vmul.f32 1.442695, %v1623_v45 }
 0x446   : > { %v1146_v57 = vpop.permute.xlu1 %1145 }
 0x447   : > { %2791 = vpow2.f32 %v1630_v47  ;;  %v1151_v63 = vcombine.low %v846_v34, %v1146_v57  ;;  %v1152_v1 = vcombine.high %v846_v34, %v1146_v57  ;;  %v2100_v47 = vld [vmem:[%s3509_s7 + $0x18] sm:$0xff] }
 0x449   : > { %v1159_v6 = vrot.slane %v1151_v63, %v3204_v54  ;;  %v1166_v7 = vrot.slane %v1152_v1, %v3204_v54 }
 0x44c   : > { %v2786_v48 = vpop.eup %2785 }
 0x44d   : > { %v1632_v41 = vsel %vm1287_vm4, %v2786_v48, 0.0 }
 0x44e   : > { %1633 = vadd.xlane.f32.xlu0 %v1632_v41 }
 0x450   : > { %v3281_v49 = vpop.eup %2787 }
 0x451   : > { %v2790_v51 = vpop.eup %2789  ;;  %v1638_v52 = vsel %vm1287_vm4, %v3281_v49, 0.0 }
 0x452   : > { %1639 = vadd.xlane.f32.xlu0 %v1638_v52  ;;  %v1635_v53 = vsel %vm1287_vm4, %v2790_v51, 0.0 }
 0x453   : > { %1636 = vadd.xlane.f32.xlu1 %v1635_v53 }
 0x454   : > { %v3286_v55 = vpop.eup %2791 }
 0x455   : > { %v1641_v56 = vsel %vm1287_vm4, %v3286_v55, 0.0 }
 0x457   : > { %1642 = vadd.xlane.f32.xlu1 %v1641_v56 }
 0x468   : > { %1148 = vrot.lane.b32.xlu1 %v846_v34, %s2904_s24  ;;  %1142 = vrot.lane.b32.xlu0 %v846_v34, %s2905_s19  ;;  %s3561_s24 = sld [smem:[#allocation10_spill]] }
 0x469   : > { %s3562_s19 = sld [smem:[#allocation13_spill]] }
 0x46f   : > { %p3565_p12 = scmp.ne.s32.totalorder %s3562_s19, 0 }
 0x4d7   : > { %v1634_v58 = vpop.xlane.xlu0 %1633 }
 0x4d8   : > { %2793 = vrcp.f32 %v1634_v58 }
 0x4db   : > { %v1640_v61 = vpop.xlane.xlu0 %1639 }
 0x4dc   : > { %v1637_v59 = vpop.xlane.xlu1 %1636 }
 0x4dd   : > { %2795 = vrcp.f32 %v1637_v59 }
 0x4de   : > { %2797 = vrcp.f32 %v1640_v61 }
 0x4df   : > { %v1143_v2 = vpop.permute.xlu0 %1142 }
 0x4e0   : > { %v1643_v62 = vpop.xlane.xlu1 %1642 }
 0x4e1   : > { %2799 = vrcp.f32 %v1643_v62 }
 0x4e4   : > { %v1149_v3 = vpop.permute.xlu1 %1148 }
 0x4e5   : > { %v1167_v4 = vcombine.low %v1143_v2, %v1149_v3  ;;  %v1168_v5 = vcombine.high %v1143_v2, %v1149_v3  ;;  %v2794_v30 = vpop.eup %2793 }
 0x4e6   : > { %v1645_v39 = vmul.f32 %v2794_v30, %v2786_v48 }
 0x4e7   : > { %v1175_v9 = vrot.slane %v1167_v4, %v3204_v54  ;;  %v1182_v10 = vrot.slane %v1168_v5, %v3204_v54 }
 0x4e9   : > { %v1183_v11 = vcombine.low %v1159_v6, %v1175_v9  ;;  %v1184_v12 = vcombine.high %v1159_v6, %v1175_v9  ;;  %v1199_v13 = vcombine.low %v1166_v7, %v1182_v10  ;;  %v1200_v14 = vcombine.high %v1166_v7, %v1182_v10  ;;  %v2099_v7 = vld [vmem:[%s3509_s7 + $0x10] sm:$0xff]  ;;  %v2098_v9 = vld [vmem:[%s3509_s7 + $0x8] sm:$0xff] }
 0x4ea   : > { %v2796_v31 = vpop.eup %2795 }
 0x4eb   : > { %v1191_v15 = vrot.slane %v1183_v11, %v3207_v60  ;;  %v1198_v16 = vrot.slane %v1184_v12, %v3207_v60  ;;  %v1207_v17 = vrot.slane %v1199_v13, %v3207_v60  ;;  %v1214_v18 = vrot.slane %v1200_v14, %v3207_v60  ;;  %v2798_v36 = vpop.eup %2797 }
 0x4ec   : > { %v1647_v40 = vmul.f32 %v2796_v31, %v2790_v51  ;;  %v1649_v44 = vmul.f32 %v2798_v36, %v3281_v49 }
 0x4ed   : > { %v1219_v19 = vcombine.low %v1191_v15, %v1198_v16  ;;  %v2510_v20 = vcombine.high %v1191_v15, %v1198_v16  ;;  %v1235_v21 = vcombine.low %v1207_v17, %v1214_v18  ;;  %v2511_v22 = vcombine.high %v1207_v17, %v1214_v18  ;;  %v2097_v18 = vld [vmem:[%s3509_s7] sm:$0xff] }
 0x4ee   : > { %v2800_v50 = vpop.eup %2799 }
 0x4ef   : > { %v1226_v23 = vrot.slane %v1219_v19, %v3204_v54  ;;  %v1234_v24 = vrot.slane %v2510_v20, %v3204_v54  ;;  %v1242_v46 = vrot.slane %v1235_v21, %v3204_v54  ;;  %v1250_v25 = vrot.slane %v2511_v22, %v3204_v54 }
 0x4f0   : > { %v1651_v45 = vmul.f32 %v2800_v50, %v3286_v55 }
 0x4f1   : > { %v1251_v26 = vcombine.low %v1226_v23, %v1234_v24  ;;  %v1267_v27 = vcombine.low %v1242_v46, %v1250_v25  ;;  %v1252_v28 = vcombine.high %v1226_v23, %v1234_v24  ;;  %v1268_v29 = vcombine.high %v1242_v46, %v1250_v25 }
 0x4f3   : > { %v1259_v32 = vrot.slane %v1251_v26, %v3207_v60  ;;  %v1275_v33 = vrot.slane %v1267_v27, %v3207_v60  ;;  %v1266_v34 = vrot.slane %v1252_v28, %v3207_v60  ;;  %v1282_v35 = vrot.slane %v1268_v29, %v3207_v60 }
 0x4f5   : > { %v1283_v37 = vcombine.low %v1259_v32, %v1275_v33  ;;  %v1284_v38 = vcombine.high %v1259_v32, %v1275_v33  ;;  %v1285_v42 = vcombine.low %v1266_v34, %v1282_v35  ;;  %v1286_v43 = vcombine.high %v1266_v34, %v1282_v35 }
 0x4f7   : > { %2649 = vmatpush3.msra.mxu0 %v1283_v37  ;;  %2654 = vmatpush3.msra.mxu1 %v1284_v38 }
 0x4f8   : > { %2651 = vmatmul.mubr.msk.f32.vlgmr.msra.gmra.mxu0 %vm1287_vm4, %v1645_v39  ;;  %2656 = vmatmul.mubr.msk.f32.vlgmr.msra.gmra.mxu1 %vm1287_vm4, %v1647_v40 }
 0x4f9   : > { %2658 = vmatprep.subr.mxu0 %v2902_v8  ;;  %2663 = vmatprep.subr.mxu1 %v2902_v8 }
 0x4fa   : > { %2659 = vmatpush3.msra.mxu0 %v1285_v42  ;;  %2664 = vmatpush3.msra.mxu1 %v1286_v43 }
 0x4fb   : > { %2660 = vmatprep.mubr.msk.f32.mxu0 %vm2903_vm1, %v2902_v8  ;;  %2665 = vmatprep.mubr.msk.f32.mxu1 %vm2903_vm1, %v2902_v8 }
 0x4fc   : > { %2661 = vmatmul.mubr.msk.f32.vlgmr.msra.gmra.mxu0 %vm1287_vm4, %v1649_v44  ;;  %2666 = vmatmul.mubr.msk.f32.vlgmr.msra.gmra.mxu1 %vm1287_vm4, %v1651_v45 }
 0x4fd   : > { %2668 = vmatprep.subr.mxu0 %v2902_v8  ;;  %2676 = vmatprep.mubr.msk.f32.mxu0 %vm2903_vm1, %v2902_v8 }
 0x4fe   : > { %2679 = vmatprep.subr.mxu1 %v2902_v8  ;;  %2687 = vmatprep.mubr.msk.f32.mxu1 %vm2903_vm1, %v2902_v8 }
 0x4ff   : > { %2669 = vmatpush3.msra.mxu0 %v2100_v47 }
 0x500   : > { %2670 = vmatprep.subr.mxu0 %v2902_v8 }
 0x501   : > { %2671 = vmatpush3.msra.mxu0 %v2099_v7  ;;  %v2325_v7 = vld [vmem:[%s3517_s15 + $0x70] sm:$0xff] }
 0x502   : > { %2672 = vmatprep.subr.mxu0 %v2902_v8 }
 0x503   : > { %2673 = vmatpush3.msra.mxu0 %v2098_v9  ;;  %v2324_v9 = vld [vmem:[%s3517_s15 + $0x68] sm:$0xff] }
 0x504   : > { %2674 = vmatprep.subr.mxu0 %v2902_v8 }
 0x505   : > { %2675 = vmatpush3.msra.mxu0 %v2097_v18  ;;  %v2315_v18 = vld [vmem:[%s3517_s15 + $0x20] sm:$0xff] }
 0x506   : > { %2690 = vmatprep.subr.mxu0 %v2902_v8 }
 0x5b8   : > { %v1721_v48 = vpop.f32.mrf.mxu0  ;;  %v1794_v41 = vpop.f32.mrf.mxu1 }
 0x5ba   : > { %v2652_v49 = vpop.f32.mrf.mxu0  ;;  %v2657_v51 = vpop.f32.mrf.mxu1 }
 0x5bb   : > { %v2221_v49 = vld [vmem:[%s3515_s13 + $0x18] sm:$0xff]  ;;  %v2219_v51 = vld [vmem:[%s3515_s13 + $0x8] sm:$0xff] }
 0x5bc   : > { %v1867_v52 = vpop.f32.mrf.mxu0  ;;  %v1940_v53 = vpop.f32.mrf.mxu1  ;;  %2680 = vmatpush3.msra.mxu1 %v2221_v49 }
 0x5bd   : > { %v1944_v55 = vcombine.low %v1721_v48, %v1867_v52  ;;  %v1945_v56 = vcombine.high %v1721_v48, %v1867_v52  ;;  %v1960_v57 = vcombine.low %v1794_v41, %v1940_v53  ;;  %v1961_v58 = vcombine.high %v1794_v41, %v1940_v53  ;;  %2681 = vmatprep.subr.mxu1 %v2902_v8  ;;  %v2218_v52 = vld [vmem:[%s3515_s13] sm:$0xff] }
 0x5be   : > { %v2662_v59 = vpop.f32.mrf.mxu0  ;;  %v2667_v61 = vpop.f32.mrf.mxu1 }
 0x5bf   : > { %v1952_v62 = vrot.slane %v1944_v55, %v3204_v54  ;;  %v1959_v63 = vrot.slane %v1945_v56, %v3204_v54  ;;  %v1968_v1 = vrot.slane %v1960_v57, %v3204_v54  ;;  %v1975_v2 = vrot.slane %v1961_v58, %v3204_v54 }
 0x5c1   : > { %v1976_v3 = vcombine.low %v1952_v62, %v1968_v1  ;;  %v1977_v4 = vcombine.high %v1952_v62, %v1968_v1  ;;  %v1992_v5 = vcombine.low %v1959_v63, %v1975_v2  ;;  %v1993_v6 = vcombine.high %v1959_v63, %v1975_v2  ;;  %v2528_v1 = vld [vmem:[%s3513_s11] ss:$0 sm:$0xff] }
 0x5c3   : > { %v1984_v10 = vrot.slane %v1976_v3, %v3207_v60  ;;  %v1991_v11 = vrot.slane %v1977_v4, %v3207_v60  ;;  %v2000_v12 = vrot.slane %v1992_v5, %v3207_v60  ;;  %v2007_v13 = vrot.slane %v1993_v6, %v3207_v60  ;;  %v2529_v3 = vld [vmem:[%s3514_s12] ss:$0 sm:$0xff]  ;;  %v2326_v6 = vld [vmem:[%s3517_s15 + $0x78] sm:$0xff] }
 0x5c5   : > { %v2012_v14 = vcombine.low %v1984_v10, %v1991_v11  ;;  %v2524_v15 = vcombine.high %v1984_v10, %v1991_v11  ;;  %v2028_v16 = vcombine.low %v2000_v12, %v2007_v13  ;;  %v2525_v17 = vcombine.high %v2000_v12, %v2007_v13  ;;  %v2323_v10 = vld [vmem:[%s3517_s15 + $0x60] sm:$0xff]  ;;  %v2322_v11 = vld [vmem:[%s3517_s15 + $0x58] sm:$0xff]  ;;  %v2321_v12 = vld [vmem:[%s3517_s15 + $0x50] sm:$0xff] }
 0x5c6   : > { %v2320_v13 = vld [vmem:[%s3517_s15 + $0x48] sm:$0xff] }
 0x5c7   : > { %v2019_v19 = vrot.slane %v2012_v14, %v3204_v54  ;;  %v2027_v20 = vrot.slane %v2524_v15, %v3204_v54  ;;  %v2035_v21 = vrot.slane %v2028_v16, %v3204_v54  ;;  %v2043_v22 = vrot.slane %v2525_v17, %v3204_v54  ;;  %v2319_v14 = vld [vmem:[%s3517_s15 + $0x40] sm:$0xff]  ;;  %v2318_v15 = vld [vmem:[%s3517_s15 + $0x38] sm:$0xff]  ;;  %v2317_v16 = vld [vmem:[%s3517_s15 + $0x30] sm:$0xff] }
 0x5c8   : > { %v2316_v17 = vld [vmem:[%s3517_s15 + $0x28] sm:$0xff] }
 0x5c9   : > { %v2045_v23 = vcombine.high %v2019_v19, %v2027_v20  ;;  %v2061_v24 = vcombine.high %v2035_v21, %v2043_v22  ;;  %v2044_v46 = vcombine.low %v2019_v19, %v2027_v20  ;;  %v2060_v25 = vcombine.low %v2035_v21, %v2043_v22  ;;  %v2314_v19 = vld [vmem:[%s3517_s15 + $0x18] sm:$0xff]  ;;  %v2313_v20 = vld [vmem:[%s3517_s15 + $0x10] sm:$0xff]  ;;  %v2312_v21 = vld [vmem:[%s3517_s15 + $0x8] sm:$0xff] }
 0x5ca   : > { %v2311_v22 = vld [vmem:[%s3517_s15] sm:$0xff] }
 0x5cb   : > { %v2059_v26 = vrot.slane %v2045_v23, %v3207_v60  ;;  %v2075_v27 = vrot.slane %v2061_v24, %v3207_v60  ;;  %v2052_v28 = vrot.slane %v2044_v46, %v3207_v60  ;;  %v2068_v29 = vrot.slane %v2060_v25, %v3207_v60  ;;  %v2526_v60 = vld [vmem:[%s3510_s8] ss:$0 sm:$0xff] }
 0x5cc   : > { %v2530_v23 = vld [vmem:[%s3516_s14] ss:$0 sm:$0xff] }
 0x5cd   : > { %v2078_v30 = vcombine.low %v2059_v26, %v2075_v27  ;;  %v2077_v31 = vcombine.high %v2052_v28, %v2068_v29  ;;  %v2076_v32 = vcombine.low %v2052_v28, %v2068_v29  ;;  %v2079_v54 = vcombine.high %v2059_v26, %v2075_v27 }
 0x5cf   : > { %2085 = vrot.lane.b32.xlu1 %v2078_v30, %s2909_s26  ;;  %2081 = vrot.lane.b32.xlu0 %v2077_v31, %s2910_s20  ;;  %s3563_s26 = sld [smem:[#allocation20_spill]]  ;;  %s2534_s20 = sshll.u32 %s3561_s24, 7 }
 0x5d0   : > { %s2418_s2 = scalar_lea.hbm %s3564_s29, %s2534_s20  ;;  %s2912_s24 = smov [#allocation5]  }
 0x5d3   : > { %2089 = vrot.lane.b32.xlu0 %v2079_v54, %s2911_s1  ;;  %s563_s1 = scalar_lea.vmem [#allocation5], %s2496_s0  ;;  %s2839_s0 = sshll.u32 %s2912_s24, 4  ;;  %s2840_s0 = int_to_ptr.vmem [resolvable:$false] %s2839_s0 }
 0x5d4   : > { %s2420_s30 = sshll.u32 %s563_s1, 4  ;;  %s2841_s21 = scalar_lea.vmem %s2840_s0, 256  ;;  %s2421_s30 = int_to_ptr.vmem [resolvable:$true] %s2420_s30 }
 0x5d5   : > { %s2835_s4 = scalar_lea.vmem %s2421_s30, 128  ;;  %p2842_p3 = scmp.lt.s32.totalorder %s2421_s30, %s2840_s0 }
 0x5d6   : > { %p2836_p11 = scmp.ne.s32.totalorder %s2421_s30, %s2835_s4  ;;  %p2843_p5 = scmp.lt.s32.totalorder %s2841_s21, %s2835_s4 }
 0x5d8   : > { %p2837_p13 = pnand %p2836_p11, %p3565_p12  ;;  %p2844_p8 = por %p2843_p5, %p2842_p3 }
 0x5da   : > { %p2838_p1 = pneg %p2837_p13 }
 0x5dc   : > { %p2845_p10 = pnand %p2844_p8, %p2838_p1 }
 0x641   : > { %v2082_v33 = vpop.permute.xlu0 %2081  ;;  %v2086_v34 = vpop.permute.xlu1 %2085 }
 0x642   : > { %v2092_v35 = vsel %vm1287_vm4, %v2076_v32, %v2082_v33  ;;  %v2532_v33 = vld [vmem:[%s3563_s26] ss:$0 sm:$0xff] }
 0x643   : > { %v2094_v37 = vsel %vm2093_vm6, %v2092_v35, %v2086_v34 }
 0x645   : > { %v2090_v36 = vpop.permute.xlu0 %2089 }
 0x646   : > { %v2096_v38 = vsel %vm2095_vm7, %v2094_v37, %v2090_v36 }
 0x647   : > { %2677 = vmatmul.mubr.msk.f32.vlgmr.msra.gmra.mxu0 %vm567_vm0, %v2096_v38 }
 0x648   : > { %2722 = vmatprep.mubr.msk.f32.mxu0 %vm2903_vm1, %v2902_v8  ;;  %2691 = vmatpush3.msra.mxu0 %v2326_v6 }
 0x649   : > { %2692 = vmatprep.subr.mxu0 %v2902_v8 }
 0x64a   : > { %2693 = vmatpush3.msra.mxu0 %v2325_v7 }
 0x64b   : > { %2694 = vmatprep.subr.mxu0 %v2902_v8 }
 0x64c   : > { %2695 = vmatpush3.msra.mxu0 %v2324_v9 }
 0x64d   : > { %2696 = vmatprep.subr.mxu0 %v2902_v8 }
 0x64e   : > { %2697 = vmatpush3.msra.mxu0 %v2323_v10 }
 0x64f   : > { %2698 = vmatprep.subr.mxu0 %v2902_v8 }
 0x650   : > { %2699 = vmatpush3.msra.mxu0 %v2322_v11 }
 0x651   : > { %2700 = vmatprep.subr.mxu0 %v2902_v8 }
 0x652   : > { %2701 = vmatpush3.msra.mxu0 %v2321_v12 }
 0x653   : > { %2702 = vmatprep.subr.mxu0 %v2902_v8 }
 0x654   : > { %2703 = vmatpush3.msra.mxu0 %v2320_v13 }
 0x655   : > { %2704 = vmatprep.subr.mxu0 %v2902_v8 }
 0x656   : > { %2705 = vmatpush3.msra.mxu0 %v2319_v14 }
 0x657   : > { %2706 = vmatprep.subr.mxu0 %v2902_v8 }
 0x658   : > { %2707 = vmatpush3.msra.mxu0 %v2318_v15 }
 0x659   : > { %2708 = vmatprep.subr.mxu0 %v2902_v8 }
 0x65a   : > { %2709 = vmatpush3.msra.mxu0 %v2317_v16 }
 0x65b   : > { %2710 = vmatprep.subr.mxu0 %v2902_v8 }
 0x65c   : > { %2711 = vmatpush3.msra.mxu0 %v2316_v17 }
 0x65d   : > { %2712 = vmatprep.subr.mxu0 %v2902_v8 }
 0x65e   : > { %2713 = vmatpush3.msra.mxu0 %v2315_v18 }
 0x65f   : > { %2714 = vmatprep.subr.mxu0 %v2902_v8 }
 0x660   : > { %2715 = vmatpush3.msra.mxu0 %v2314_v19 }
 0x661   : > { %2716 = vmatprep.subr.mxu0 %v2902_v8 }
 0x662   : > { %2717 = vmatpush3.msra.mxu0 %v2313_v20 }
 0x663   : > { %2718 = vmatprep.subr.mxu0 %v2902_v8 }
 0x664   : > { %2719 = vmatpush3.msra.mxu0 %v2312_v21 }
 0x665   : > { %2720 = vmatprep.subr.mxu0 %v2902_v8 }
 0x666   : > { %2721 = vmatpush3.msra.mxu0 %v2311_v22 }
 0x707   : > { %v2177_v39 = vpop.f32.mrf.mxu0 }
 0x708   : > { %v2178_v40 = vadd.f32 %v2526_v60, %v2177_v39 }
 0x709   : > { %v2678_v50 = vpop.f32.mrf.mxu0 }
 0x70a   : > { %v3366_v42 = vadd.f32 %v2178_v40, %v3111_v0  ;;  %v2220_v0 = vld [vmem:[%s3515_s13 + $0x10] sm:$0xff] }
 0x70b   : > { %2682 = vmatpush3.msra.mxu1 %v2220_v0 }
 0x70c   : > { %v2184_v43 = vsel %vm567_vm0, %v3366_v42, 0.0  ;;  %2683 = vmatprep.subr.mxu1 %v2902_v8 }
 0x70d   : > { %2185 = vadd.xlane.f32.xlu1 %v2184_v43  ;;  %2684 = vmatpush3.msra.mxu1 %v2219_v51 }
 0x70e   : > { %2685 = vmatprep.subr.mxu1 %v2902_v8 }
 0x70f   : > { %2686 = vmatpush3.msra.mxu1 %v2218_v52 }
 0x796   : > { %v2186_v44 = vpop.xlane.xlu1 %2185 }
 0x797   : > { %v2187_v45 = vmul.f32 0.03125, %v2186_v44 }
 0x799   : > { %v2188_v47 = vsub.f32 %v3366_v42, %v2187_v45 }
 0x79b   : > { %v2189_v48 = vmul.f32 %v2188_v47, %v2188_v47 }
 0x79d   : > { %v2190_v41 = vsel %vm567_vm0, %v2189_v48, 0.0 }
 0x79e   : > { %2191 = vadd.xlane.f32.xlu0 %v2190_v41 }
 0x827   : > { %v2192_v53 = vpop.xlane.xlu0 %2191 }
 0x828   : > { %v2193_v55 = vmul.f32 0.03125, %v2192_v53 }
 0x82a   : > { %v2194_v56 = vadd.f32 1e-05, %v2193_v55 }
 0x82c   : > { %2801 = vrsqrt.f32 %v2194_v56  ;;  %vm2197_vm8 = vcmp.eq.f32.partialorder %v2194_v56, inf  ;;  %v2200_v59 = vand.u32 2147483648, %v2194_v56  ;;  %vm2199_vm9 = vcmp.eq.f32.partialorder %v2194_v56, 0.0 }
 0x839   : > { %v2802_v57 = vpop.eup %2801 }
 0x83a   : > { %v2196_v58 = vmul.f32 %v2802_v57, %v2194_v56 }
 0x83c   : > { %v2198_v61 = vsel %vm2197_vm8, %v2194_v56, %v2196_v58 }
 0x83d   : > { %v2201_v62 = vsel %vm2199_vm9, %v2200_v59, %v2198_v61 }
 0x83e   : > { %2803 = vrcp.f32 %v2201_v62 }
 0x84b   : > { %v2804_v63 = vpop.eup %2803 }
 0x84c   : > { %v2203_v2 = vmul.f32 %v2804_v63, %v2188_v47 }
 0x84e   : > { %v2210_v4 = vmul.f32 %v2528_v1, %v2203_v2 }
 0x850   : > { %v2217_v5 = vadd.f32 %v2529_v3, %v2210_v4 }
 0x852   : > { %2688 = vmatmul.mubr.msk.f32.vlgmr.msra.gmra.mxu1 %vm567_vm0, %v2217_v5 }
 0x912   : > { %v2298_v24 = vpop.f32.mrf.mxu1 }
 0x913   : > { %v2299_v46 = vadd.f32 %v2530_v23, %v2298_v24 }
 0x914   : > { %v2689_v25 = vpop.f32.mrf.mxu1 }
 0x915   : > { %v2303_v26 = vmul.f32 %v2299_v46, %v2299_v46  ;;  %v2302_v32 = vmul.f32 0.5, %v2299_v46 }
 0x917   : > { %v2304_v27 = vmul.f32 %v2303_v26, %v2299_v46 }
 0x919   : > { %v2305_v28 = vmul.f32 0.044715, %v2304_v27 }
 0x91b   : > { %v2306_v29 = vadd.f32 %v2305_v28, %v2299_v46 }
 0x91d   : > { %v2307_v30 = vmul.f32 0.7978846, %v2306_v29 }
 0x91f   : > { %2805 = vtanh.f32 %v2307_v30 }
 0x92c   : > { %v2806_v31 = vpop.eup %2805 }
 0x92d   : > { %v2309_v8 = vadd.f32 1.0, %v2806_v31 }
 0x92f   : > { %v2310_v54 = vmul.f32 %v2309_v8, %v2302_v32 }
 0x931   : > { %2723 = vmatmul.mubr.f32.vlgmr.msra.gmra.mxu0 %v2310_v54 }
 0x9f1   : > { %v2400_v34 = vpop.f32.mrf.mxu0 }
 0x9f2   : > { %v2401_v35 = vadd.f32 %v2532_v33, %v2400_v34 }
 0x9f3   : > { %v2724_v36 = vpop.f32.mrf.mxu0 }
 0x9f4   : > { %v2404_v37 = vadd.f32 %v2401_v35, %v3366_v42 }
 0x9f6   : > { %2405 = vst.msk [vmem:[%s563_s1] sm:$0xff] %vm567_vm0, %v2404_v37 }
 0x9f7   : > { %2848 = shalt.err (!%p2845_p10)
}
 0x9f8   : > { %s2849_s16 = scalar_lea.hbm %s2418_s2, 128  ;;  %s2853_s20 = scalar_lea.hbm %s3564_s29, 256 }
 0x9f9   : > { %p2850_p2 = scmp.ne.s32.totalorder %s2418_s2, %s2849_s16  ;;  %p2854_p7 = scmp.lt.s32.totalorder %s2418_s2, %s3564_s29 }
 0x9fa   : > { %p2855_p0 = scmp.lt.s32.totalorder %s2853_s20, %s2849_s16 }
 0x9fb   : > { %p2851_p4 = pnand %p2850_p2, %p3565_p12 }
 0x9fc   : > { %p2856_p6 = por %p2855_p0, %p2854_p7 }
 0x9fd   : > { %p2852_p9 = pneg %p2851_p4 }
 0x9ff   : > { %p2857_p11 = pnand %p2856_p6, %p2852_p9 }
 0xa01   : > { %2860 = shalt.err (!%p2857_p11)
}
 0xa02   : > { %2727 = dma.vmem_to_hbm [thread:$0]  (%p3565_p12), %s2421_s30, 128, %s2418_s2, %s2407_s3  }
 0xa03 PF: > { %s3566_s4 = sld [smem:[#allocation8_spill]]  ;;  %p3569_p1 = scmp.ge.s32.totalorder %s2899_s27, 2 }
 0xa04   : > { %s3567_s18 = sld [smem:[#allocation14_spill]] }
 0xa09   : > { %s2432_s24 = sand.u32 1, %s3566_s4  }
 0xa0a   : > { %p3568_p13 = scmp.ne.s32.totalorder %s3567_s18, 0  ;;  %s2433_s0 = scalar_lea.sflag [#allocation4], %s2432_s24 }
 0xa0c   : > { %p2734_p3 = pnand %p3569_p1, %p3568_p13 }
 0xa0e   : > { %p2735_p5 = pneg %p2734_p3 }
 0xa10   : > { %2882 = dma.done.wait (%p2735_p5), %s2433_s0, 128  }
 0xa11   : > { %2884 = vsyncadd (%p2735_p5), %s2433_s0, 4294967168  ;;  %s3570_s27 = sld [smem:[#allocation11_spill]]  ;;  %s3573_s24 = smov %s2891_s25 }
 0xa12   : > { %s3571_s21 = sld [smem:[#allocation9_spill]] }
 0xa13   : > { %s3572_s26 = sld [smem:[#allocation12_spill]] }
 0xa17   : > { %p30_p8 = scmp.ge.s32.totalorder %s3570_s27, 4  }
 0xa18   : > { %s3574_s25 = smov %s3571_s21 }
 0xa19   :  { %32 = sbr.rel (!%p30_p8) target bundleno = 13 (0xd), region = 133 }
 0xa1e   :  { %2438 = vsyncpa [#allocation3], 1 }
 0xa1f   :  { %2440 = vsyncpa [#allocation3 + $0x1], 1 }
 0xa20   :  { %2441 = vsyncpa [#allocation4], 1 }
 0xa21   :  { %2443 = vsyncpa [#allocation4 + $0x1], 1 }

</bundles_post_ra>
